<compile_context>
chip_gen: v5e
topology: v5e:2x2
jax: 0.10.0
libtpu: 0.0.40
codegen_flags: <defaults>
</compile_context>

<pallas_src>
from collections import OrderedDict

import jax
import jax.numpy as jnp
from jax.experimental import pallas as pl
from jax.experimental.pallas import tpu as pltpu


# ---------------------------------------------------------------------------
# Pallas kernel: fused backbone(1x1 conv)+ReLU, fused cls+reg head,
# max/argmax over classes on logits, sigmoid of max logit, anchor decode.
# Layout: channels/classes on sublanes, anchors (positions) on lanes.
# ---------------------------------------------------------------------------
def _retina_head_kernel(x_ref, w0t_ref, b0_ref, wht_ref, bh_ref, anch_ref,
                        boxes_ref, labels_ref, scores_ref):
    # backbone: 1x1 conv == (chid, cin) @ (cin, tile_p), + bias, ReLU
    feat = jnp.dot(w0t_ref[...], x_ref[...],
                   preferred_element_type=jnp.float32)
    feat = jnp.maximum(feat + b0_ref[...], 0.0)               # (chid, tile_p)

    # fused cls+reg head in a single MXU pass: (nc+4, chid) @ (chid, tile_p)
    head = jnp.dot(wht_ref[...], feat.astype(wht_ref.dtype),
                   preferred_element_type=jnp.float32) + bh_ref[...]

    num_classes = head.shape[0] - 4
    logits = head[:num_classes, :]                            # (nc, tile_p)
    reg = head[num_classes:, :]                               # (4,  tile_p)

    # anchor decode (simple additive deltas) -> lane-dense (4, tile_p) store
    boxes_ref[...] = (anch_ref[...] + reg).astype(boxes_ref.dtype)

    # per-anchor best class; sigmoid is monotone so argmax/max on raw logits,
    # sigmoid only on the single max-logit row.
    m = jnp.max(logits, axis=0, keepdims=True)                # (1, tile_p)
    cls_idx = jax.lax.broadcasted_iota(jnp.int32, logits.shape, 0)
    lbl = jnp.min(jnp.where(logits >= m, cls_idx, num_classes),
                  axis=0, keepdims=True)                      # first-argmax
    labels_ref[...] = lbl.astype(labels_ref.dtype)
    scores_ref[...] = (1.0 / (1.0 + jnp.exp(-m))).astype(scores_ref.dtype)


def retina_heads_pallas(x_t, params, anchors_t, *, tile_p=2048):
    """x_t: (Cin, P) bf16, anchors_t: (4, P) f32.
    Returns boxes_t (4,P) f32, labels_t (1,P) i32, scores_t (1,P) f32."""
    w0t, b0, wht, bh = params
    cin, P = x_t.shape
    chid = w0t.shape[0]
    nc_plus_4 = wht.shape[0]
    assert w0t.shape[1] == cin and anchors_t.shape == (4, P)

    # Tile choice: big tiles to amortize ~0.35us/step overhead, but keep
    # >= 2 grid steps when the problem allows it (v7x has 2 TensorCores).
    cap = max(128, (P // 2) // 128 * 128)
    tile_p = max(128, (min(tile_p, cap) // 128) * 128)
    P_pad = pl.cdiv(P, tile_p) * tile_p
    if P_pad != P:
        x_t = jnp.pad(x_t, ((0, 0), (0, P_pad - P)))
        anchors_t = jnp.pad(anchors_t, ((0, 0), (0, P_pad - P)))

    grid = (P_pad // tile_p,)
    full = lambda i: (0, 0)
    tiled = lambda i: (0, i)   # tile along the lane (anchor) axis

    boxes_t, labels_t, scores_t = pl.pallas_call(
        _retina_head_kernel,
        out_shape=(
            jax.ShapeDtypeStruct((4, P_pad), jnp.float32),
            jax.ShapeDtypeStruct((1, P_pad), jnp.int32),
            jax.ShapeDtypeStruct((1, P_pad), jnp.float32),
        ),
        grid_spec=pltpu.PrefetchScalarGridSpec(
            num_scalar_prefetch=0,
            grid=grid,
            in_specs=[
                pl.BlockSpec((cin, tile_p), tiled),        # x (bf16)
                pl.BlockSpec((chid, cin), full),           # W0^T (bf16)
                pl.BlockSpec((chid, 1), full),             # b0 (f32)
                pl.BlockSpec((nc_plus_4, chid), full),     # [Wc|Wr]^T (bf16)
                pl.BlockSpec((nc_plus_4, 1), full),        # [bc|br] (f32)
                pl.BlockSpec((4, tile_p), tiled),          # anchors
            ],
            out_specs=[
                pl.BlockSpec((4, tile_p), tiled),          # boxes (lane-dense)
                pl.BlockSpec((1, tile_p), tiled),          # labels
                pl.BlockSpec((1, tile_p), tiled),          # scores
            ],
        ),
        compiler_params=pltpu.CompilerParams(
            dimension_semantics=("parallel",)),
    )(x_t, w0t, b0, wht, bh, anchors_t)

    return boxes_t[:, :P], labels_t[:, :P], scores_t[:, :P]


# ---------------------------------------------------------------------------
# Glue: the "model" + the RetinaNetModelOutputWrapper semantics
# ---------------------------------------------------------------------------
def make_params(key, cin, chid, num_classes):
    k0, k1, k2 = jax.random.split(key, 3)
    w0 = jax.random.normal(k0, (cin, chid), jnp.float32) * 0.2
    b0 = jnp.zeros((chid, 1), jnp.float32)
    wc = jax.random.normal(k1, (chid, num_classes), jnp.float32) * 0.2
    bc = jnp.full((num_classes, 1), -1.0, jnp.float32)   # RetinaNet prior bias
    wr = jax.random.normal(k2, (chid, 4), jnp.float32) * 0.1
    br = jnp.zeros((4, 1), jnp.float32)
    # kernel-friendly forms: transposed (anchors-on-lanes) + fused cls|reg head
    w0t = jnp.transpose(w0).astype(jnp.bfloat16)                       # (chid, cin)
    wht = jnp.transpose(jnp.concatenate([wc, wr], axis=1)
                        ).astype(jnp.bfloat16)                         # (nc+4, chid)
    bh = jnp.concatenate([bc, br], axis=0)                             # (nc+4, 1)
    return (w0t, b0, wht, bh)


def make_anchors(B, H, W, stride=8.0):
    ys = (jnp.arange(H, dtype=jnp.float32) + 0.5) * stride
    xs = (jnp.arange(W, dtype=jnp.float32) + 0.5) * stride
    cy, cx = jnp.meshgrid(ys, xs, indexing="ij")
    half = stride / 2.0
    anchors = jnp.stack(
        [cx - half, cy - half, cx + half, cy + half], axis=-1).reshape(H * W, 4)
    return jnp.tile(anchors, (B, 1))  # (B*H*W, 4)


def retinanet_model_output_wrapper_forward(x, params, anchors):
    """Mirrors RetinaNetModelOutputWrapper.forward: returns
    [{'boxes','labels','scores'}] for the first image. x is NCHW float32."""
    B, C, H, W = x.shape
    # anchors-on-lanes layout: NCHW -> (C, B*H*W); positions are lane-dense.
    x_t = jnp.transpose(x, (1, 0, 2, 3)).reshape(C, B * H * W).astype(jnp.bfloat16)
    anchors_t = jnp.transpose(anchors)                      # (4, P)
    boxes_t, labels_t, scores_t = retina_heads_pallas(x_t, params, anchors_t)

    # model(x)[0] -> detections of the first image only
    n0 = H * W
    # TODO(synk): torchvision RetinaNet postprocessing (score threshold, top-k,
    # NMS) is data-dependent dynamic-shape and has no clean Pallas equivalent;
    # outputs are per-anchor best-class detections.
    d = OrderedDict()
    d["boxes"] = jnp.transpose(boxes_t[:, :n0])             # (H*W, 4)
    d["labels"] = labels_t[0, :n0]                          # (H*W,)
    d["scores"] = scores_t[0, :n0]                          # (H*W,)
    return [d]


if __name__ == "__main__":
    B, C, H, W = 2, 8, 16, 16
    CHID, NUM_CLASSES = 32, 8

    key = jax.random.PRNGKey(0)
    kx, kp = jax.random.split(key)
    x = jax.random.normal(kx, (B, C, H, W), jnp.float32)
    params = make_params(kp, C, CHID, NUM_CLASSES)
    anchors = make_anchors(B, H, W)

    out = retinanet_model_output_wrapper_forward(x, params, anchors)
    jax.block_until_ready(out[0]["boxes"])
    jax.block_until_ready(out[0]["labels"])
    jax.block_until_ready(out[0]["scores"])

    assert out[0]["boxes"].shape == (H * W, 4)
    assert out[0]["labels"].shape == (H * W,)
    assert out[0]["scores"].shape == (H * W,)
    assert bool(jnp.all(jnp.isfinite(out[0]["boxes"])))
    assert bool(jnp.all(jnp.isfinite(out[0]["scores"])))
    assert bool(jnp.all((out[0]["labels"] >= 0) & (out[0]["labels"] < NUM_CLASSES)))
    print("KERNEL_OK")
</pallas_src>

<mosaic_0001>
module attributes {stable_mosaic.version = 11 : i64} {
  func.func @_retina_head_kernel(%arg0: i32, %arg1: memref<8x256xbf16, #tpu.memory_space<vmem>>, %arg2: memref<32x8xbf16, #tpu.memory_space<vmem>>, %arg3: memref<32x1xf32, #tpu.memory_space<vmem>>, %arg4: memref<12x32xbf16, #tpu.memory_space<vmem>>, %arg5: memref<12x1xf32, #tpu.memory_space<vmem>>, %arg6: memref<4x256xf32, #tpu.memory_space<vmem>>, %arg7: memref<4x256xf32, #tpu.memory_space<vmem>>, %arg8: memref<1x256xi32, #tpu.memory_space<vmem>>, %arg9: memref<1x256xf32, #tpu.memory_space<vmem>>) attributes {dimension_semantics = [#tpu.dimension_semantics<parallel>], iteration_bounds = array<i64: 2>, scalar_prefetch = 0 : i64, scratch_operands = 0 : i64, tpu.core_type = #tpu.core_type<tc>, window_params = [{transform_indices = @transform_0, window_bounds = array<i64: 8, 256>}, {pipeline_mode = #tpu.pipeline_mode<synchronous>, transform_indices = @transform_1, window_bounds = array<i64: 32, 8>}, {pipeline_mode = #tpu.pipeline_mode<synchronous>, transform_indices = @transform_2, window_bounds = array<i64: 32, 1>}, {pipeline_mode = #tpu.pipeline_mode<synchronous>, transform_indices = @transform_3, window_bounds = array<i64: 12, 32>}, {pipeline_mode = #tpu.pipeline_mode<synchronous>, transform_indices = @transform_4, window_bounds = array<i64: 12, 1>}, {transform_indices = @transform_5, window_bounds = array<i64: 4, 256>}, {transform_indices = @transform_6, window_bounds = array<i64: 4, 256>}, {transform_indices = @transform_7, window_bounds = array<i64: 1, 256>}, {transform_indices = @transform_8, window_bounds = array<i64: 1, 256>}]} {
    %c0 = arith.constant 0 : index
    %c0_0 = arith.constant 0 : index
    %0 = vector.load %arg2[%c0, %c0_0] : memref<32x8xbf16, #tpu.memory_space<vmem>>, vector<32x8xbf16>
    %c0_1 = arith.constant 0 : index
    %c0_2 = arith.constant 0 : index
    %1 = vector.load %arg1[%c0_1, %c0_2] : memref<8x256xbf16, #tpu.memory_space<vmem>>, vector<8x256xbf16>
    %cst = arith.constant dense<0.000000e+00> : vector<32x256xf32>
    %2 = tpu.matmul %0, %1, %cst {dimension_numbers = #tpu.dot_dimension_numbers<[1], [0], [0], [1], [0, 0, 1, 1], [], []>} : vector<32x8xbf16>, vector<8x256xbf16>, vector<32x256xf32> -> vector<32x256xf32>
    %c0_3 = arith.constant 0 : index
    %c0_4 = arith.constant 0 : index
    %3 = vector.load %arg3[%c0_3, %c0_4] : memref<32x1xf32, #tpu.memory_space<vmem>>, vector<32x1xf32>
    %4 = vector.broadcast %3 : vector<32x1xf32> to vector<32x256xf32>
    %5 = arith.addf %2, %4 : vector<32x256xf32>
    %cst_5 = arith.constant 0.000000e+00 : f32
    %6 = vector.broadcast %cst_5 : f32 to vector<32x256xf32>
    %7 = arith.maximumf %5, %6 : vector<32x256xf32>
    %c0_6 = arith.constant 0 : index
    %c0_7 = arith.constant 0 : index
    %8 = vector.load %arg4[%c0_6, %c0_7] : memref<12x32xbf16, #tpu.memory_space<vmem>>, vector<12x32xbf16>
    %9 = arith.truncf %7 : vector<32x256xf32> to vector<32x256xbf16>
    %cst_8 = arith.constant dense<0.000000e+00> : vector<12x256xf32>
    %10 = tpu.matmul %8, %9, %cst_8 {dimension_numbers = #tpu.dot_dimension_numbers<[1], [0], [0], [1], [0, 0, 1, 1], [], []>} : vector<12x32xbf16>, vector<32x256xbf16>, vector<12x256xf32> -> vector<12x256xf32>
    %c0_9 = arith.constant 0 : index
    %c0_10 = arith.constant 0 : index
    %11 = vector.load %arg5[%c0_9, %c0_10] : memref<12x1xf32, #tpu.memory_space<vmem>>, vector<12x1xf32>
    %12 = vector.broadcast %11 : vector<12x1xf32> to vector<12x256xf32>
    %13 = arith.addf %10, %12 : vector<12x256xf32>
    %14 = vector.extract_strided_slice %13 {offsets = [0, 0], sizes = [8, 256], strides = [1, 1]} : vector<12x256xf32> to vector<8x256xf32>
    %15 = vector.extract_strided_slice %13 {offsets = [8, 0], sizes = [4, 256], strides = [1, 1]} : vector<12x256xf32> to vector<4x256xf32>
    %c0_11 = arith.constant 0 : index
    %c0_12 = arith.constant 0 : index
    %16 = vector.load %arg6[%c0_11, %c0_12] : memref<4x256xf32, #tpu.memory_space<vmem>>, vector<4x256xf32>
    %17 = arith.addf %16, %15 : vector<4x256xf32>
    %c0_13 = arith.constant 0 : index
    %c0_14 = arith.constant 0 : index
    %18 = vector.load %arg7[%c0_13, %c0_14] : memref<4x256xf32, #tpu.memory_space<vmem>>, vector<4x256xf32>
    tpu.vector_store %arg7[%c0_13, %c0_14], %17 {strides = array<i32>} : memref<4x256xf32, #tpu.memory_space<vmem>>, vector<4x256xf32>,
    %cst_15 = arith.constant dense<0xFF800000> : vector<256xf32>
    %19 = vector.multi_reduction <maximumf>, %14, %cst_15 [0] : vector<8x256xf32> to vector<256xf32>
    %20 = vector.shape_cast %19 : vector<256xf32> to vector<1x256xf32>
    %21 = tpu.iota {dimensions = array<i32: 0>} : vector<8x256xi32>
    %22 = vector.broadcast %20 : vector<1x256xf32> to vector<8x256xf32>
    %23 = arith.cmpf oge, %14, %22 : vector<8x256xf32>
    %c8_i32 = arith.constant 8 : i32
    %24 = vector.broadcast %c8_i32 : i32 to vector<8x256xi32>
    %25 = arith.select %23, %21, %24 : vector<8x256xi1>, vector<8x256xi32>
    %cst_16 = arith.constant dense<2147483647> : vector<256xi32>
    %26 = vector.multi_reduction <minsi>, %25, %cst_16 [0] : vector<8x256xi32> to vector<256xi32>
    %27 = vector.shape_cast %26 : vector<256xi32> to vector<1x256xi32>
    %c0_17 = arith.constant 0 : index
    %c0_18 = arith.constant 0 : index
    %28 = vector.load %arg8[%c0_17, %c0_18] : memref<1x256xi32, #tpu.memory_space<vmem>>, vector<1x256xi32>
    tpu.vector_store %arg8[%c0_17, %c0_18], %27 {strides = array<i32>} : memref<1x256xi32, #tpu.memory_space<vmem>>, vector<1x256xi32>,
    %cst_19 = arith.constant 0.000000e+00 : f32
    %29 = vector.broadcast %cst_19 : f32 to vector<1x256xf32>
    %30 = arith.subf %29, %20 : vector<1x256xf32>
    %31 = math.exp %30 : vector<1x256xf32>
    %cst_20 = arith.constant 1.000000e+00 : f32
    %32 = vector.broadcast %cst_20 : f32 to vector<1x256xf32>
    %33 = arith.addf %32, %31 : vector<1x256xf32>
    %cst_21 = arith.constant 1.000000e+00 : f32
    %34 = vector.broadcast %cst_21 : f32 to vector<1x256xf32>
    %35 = arith.divf %34, %33 : vector<1x256xf32>
    %c0_22 = arith.constant 0 : index
    %c0_23 = arith.constant 0 : index
    %36 = vector.load %arg9[%c0_22, %c0_23] : memref<1x256xf32, #tpu.memory_space<vmem>>, vector<1x256xf32>
    tpu.vector_store %arg9[%c0_22, %c0_23], %35 {strides = array<i32>} : memref<1x256xf32, #tpu.memory_space<vmem>>, vector<1x256xf32>,
    return
  }
  func.func @transform_0(%arg0: i32) -> (i32, i32) {
    %c0_i32 = arith.constant 0 : i32
    %c0_i32_0 = arith.constant 0 : i32
    return %c0_i32, %arg0 : i32, i32
  }
  func.func @transform_1(%arg0: i32) -> (i32, i32) {
    %c0_i32 = arith.constant 0 : i32
    %c0_i32_0 = arith.constant 0 : i32
    %c0_i32_1 = arith.constant 0 : i32
    return %c0_i32, %c0_i32_0 : i32, i32
  }
  func.func @transform_2(%arg0: i32) -> (i32, i32) {
    %c0_i32 = arith.constant 0 : i32
    %c0_i32_0 = arith.constant 0 : i32
    %c0_i32_1 = arith.constant 0 : i32
    return %c0_i32, %c0_i32_0 : i32, i32
  }
  func.func @transform_3(%arg0: i32) -> (i32, i32) {
    %c0_i32 = arith.constant 0 : i32
    %c0_i32_0 = arith.constant 0 : i32
    %c0_i32_1 = arith.constant 0 : i32
    return %c0_i32, %c0_i32_0 : i32, i32
  }
  func.func @transform_4(%arg0: i32) -> (i32, i32) {
    %c0_i32 = arith.constant 0 : i32
    %c0_i32_0 = arith.constant 0 : i32
    %c0_i32_1 = arith.constant 0 : i32
    return %c0_i32, %c0_i32_0 : i32, i32
  }
  func.func @transform_5(%arg0: i32) -> (i32, i32) {
    %c0_i32 = arith.constant 0 : i32
    %c0_i32_0 = arith.constant 0 : i32
    return %c0_i32, %arg0 : i32, i32
  }
  func.func @transform_6(%arg0: i32) -> (i32, i32) {
    %c0_i32 = arith.constant 0 : i32
    %c0_i32_0 = arith.constant 0 : i32
    return %c0_i32, %arg0 : i32, i32
  }
  func.func @transform_7(%arg0: i32) -> (i32, i32) {
    %c0_i32 = arith.constant 0 : i32
    %c0_i32_0 = arith.constant 0 : i32
    return %c0_i32, %arg0 : i32, i32
  }
  func.func @transform_8(%arg0: i32) -> (i32, i32) {
    %c0_i32 = arith.constant 0 : i32
    %c0_i32_0 = arith.constant 0 : i32
    return %c0_i32, %arg0 : i32, i32
  }
}

</mosaic_0001>

<bundles_post_ra>
// kernel: tpu_custom_call.1
= control target key start
LH: loop header
LB: loop body
LE: loop exit
PB: predicated region body
PF: predicated region fallthrough
CT: control target
= control target key end

     0   :  { %14 = vsyncpa [#allocation3], 0  ;;  %s1269_s0 = inlined_call_operand.vmem [shape: bf16[8,512], index: 0, kind: input, shape index: {}]   ;;  %s1270_s1 = inlined_call_operand.vmem [shape: bf16[32,8], index: 1, kind: input, shape index: {}]   ;;  %s1271_s2 = inlined_call_operand.vmem [shape: f32[32,1], index: 2, kind: input, shape index: {}]   ;;  %s1272_s3 = inlined_call_operand.vmem [shape: bf16[12,32], index: 3, kind: input, shape index: {}]   ;;  %s1273_s4 = inlined_call_operand.vmem [shape: f32[12,1], index: 4, kind: input, shape index: {}]   ;;  %s1274_s5 = inlined_call_operand.vmem [shape: f32[4,512], index: 5, kind: input, shape index: {}]   ;;  %s1275_s6 = inlined_call_operand.hbm [shape: f32[4,512], index: 6, kind: output, shape index: {0}]   ;;  %s1276_s7 = inlined_call_operand.hbm [shape: s32[1,512], index: 7, kind: output, shape index: {1}]   ;;  %s1277_s8 = inlined_call_operand.hbm [shape: f32[1,512], index: 8, kind: output, shape index: {2}]  }
   0x1   :  { %16 = vsyncpa [#allocation3 + $0x1], 0 }
   0x2   :  { %17 = vsyncpa [#allocation5], 0 }
   0x3   :  { %19 = vsyncpa [#allocation5 + $0x1], 0  ;;  %s1067_s27 = smov 0   ;;  %s1069_s28 = smov 0  }
   0x4   :  { %s1071_s29 = smov 0   ;;  %s1073_s30 = smov 0  }
   0x5 LB: > { %s1088_s9 = sadd.s32 4294967295, %s1019_s30   ;;  %s1278_s10 = sadd.s32 4294967294, %s1019_s30   ;;  %s1019_s30 = sphi %s1073_s30, %s1291_s30   ;;  %s1015_s29 = sphi %s1071_s29, %s1290_s29   ;;  %s1011_s28 = sphi %s1069_s28, %s1289_s28   ;;  %s1007_s27 = sphi %s1067_s27, %s1288_s27  }
   0x6   : > { %s1092_s11 = sadd.s32 1, %s1019_s30   ;;  %s168_s12 = sadd.s32 1, %s1015_s29 }
   0x7   : > { %s165_s13 = ssub.s32 %s1019_s30, %s1092_s11  ;;  %p178_p0 = scmp.ne.s32.totalorder %s1015_s29, %s1011_s28 }
   0x8   : > { %p166_p1 = scmp.eq.s32.totalorder %s165_s13, 0  ;;  %p179_p2 = scmp.eq.s32.totalorder %s1088_s9, 1 }
   0x9   : > { %p184_p3 = scmp.ne.s32.totalorder %s1011_s28, %s1007_s27  ;;  %p185_p4 = scmp.eq.s32.totalorder %s1278_s10, 1 }
   0xa   : > { %s1105_s14 = scalar_select %p166_p1, %s1015_s29, %s168_s12  }
   0xb   : > { %p1107_p5 = por %p179_p2, %p178_p0  ;;  %p1111_p6 = por %p185_p4, %p184_p3 }
   0xc   : > { %p797_p7 = scmp.ge.s32.totalorder %s1019_s30, 1  ;;  %p285_p8 = scmp.lt.s32.totalorder %s1019_s30, 3 }
   0xe   : > { %p286_p9 = pnand %p797_p7, %p285_p8 }
   0xf   : > { %s1118_s17 = sshll.u32 (!%p286_p9), %s1088_s9, 1  ;;  %s1163_s25 = sand.u32 (!%p286_p9), 1, %s1011_s28  }
  0x10   : > { %289 = sbr.rel (%p286_p9) target bundleno = 381 (0x17d), region = 44  ;;  %p335_p10 = scmp.lt.s32.totalorder (!%p286_p9), %s1118_s17, 3 }
  0x11   : > { %s798_s19 = sshll.u32 (!%p286_p9), %s1163_s25, 3  ;;  %s917_s21 = scalar_lea.hbm (!%p286_p9), %s1275_s6, 16 }
  0x15   : > { %v355_v0 = vld [vmem:[%s1271_s2] sm:$0xff]  ;;  %v1021_v1 = vmov 0   ;;  %v357_v2 = vld [vmem:[%s1271_s2 + $0x10] sm:$0xff]  ;;  %s1128_s22 = scalar_select %p335_p10, %s1118_s17, 3  ;;  %v356_v4 = vld [vmem:[%s1271_s2 + $0x8] sm:$0xff]  ;;  %vm401_vm0 = vcmask 1043456   ;;  %v529_v63 = vlaneseq }
  0x16   : > { %887 = vset.pattern.permute.xlu1 %v1021_v1  ;;  %886 = vset.pattern.permute.xlu0 %v1021_v1  ;;  %v358_v5 = vld [vmem:[%s1271_s2 + $0x18] sm:$0xff]  ;;  %v832_v12 = vld [vmem:[%s1270_s1] sm:$0xff]  ;;  %vm394_vm1 = vcmask 64512   ;;  %v833_v13 = vld [vmem:[%s1270_s1 + $0x8] sm:$0xff]  ;;  %vm477_vm2 = vcmask 261120  }
  0x17   : > { %361 = vperm.xlu1 %887, %v355_v0   ;;  %371 = vperm.xlu0 %886, %v357_v2   ;;  %s802_s23 = sshll.u32 %s1128_s22, 2  ;;  %v460_v16 = vld [vmem:[%s1273_s4] sm:$0xff]  ;;  %v461_v20 = vld [vmem:[%s1273_s4 + $0x8] sm:$0xf]  ;;  %s319_s22 = scalar_lea.vmem [#allocation2], %s798_s19 }
  0x18   : > { %888 = vset.pattern.permute.xlu2 %v1021_v1  ;;  %s338_s26 = scalar_lea.vmem %s1269_s0, %s802_s23  ;;  %v819_v46 = vld [vmem:[%s1272_s3] sm:$0xf]  ;;  %v834_v47 = vld [vmem:[%s1272_s3] sm:$0x30]  ;;  %s344_s18 = scalar_lea.vmem %s1274_s5, %s802_s23 }
  0x19   : > { %v354_v3 = vld [vmem:[%s338_s26] sm:$0xff]  ;;  %464 = vperm.xlu2 %888, %v460_v16   ;;  %v820_v50 = vor.u32 %v834_v47, %v819_v46  ;;  %s835_s26 = sshll.u32 %s1088_s9, 3  ;;  %s629_s23 = sshll.u32 %s319_s22, 4  ;;  %s630_s23 = int_to_ptr.vmem [resolvable:$true] %s629_s23 }
  0x1a   : > { %v390_v6 = vunpack.c.l.b16 %v354_v3  ;;  %v391_v7 = vunpack.c.h.b16 %v354_v3  ;;  %s627_s24 = scalar_lea.hbm %s1275_s6, %s835_s26  ;;  %s606_s26 = scalar_lea.sflag [#allocation3], %s1163_s25 }
  0x1b   : > { %s631_s12 = sshll.u32 %s627_s24, 4  ;;  %s632_s12 = int_to_ptr.hbm [resolvable:$true] %s631_s12 }
  0x1c   : > { %v392_v8 = vpack.c.b16 %v390_v6, %v390_v6  ;;  %v393_v9 = vpack.c.b16 %v391_v7, %v391_v7  ;;  %s911_s13 = sshra.s32 %s632_s12, 4  ;;  %s912_s13 = int_to_ptr.hbm [resolvable:$true] %s911_s13 }
  0x1d   : > { %p918_p0 = scmp.lt.s32.totalorder %s912_s13, %s1275_s6 }
  0x1e   : > { %v403_v10 = vsel %vm401_vm0, %v392_v8, 0  ;;  %v406_v11 = vsel %vm401_vm0, %v393_v9, 0 }
  0x1f   : > { %366 = vperm.xlu1 %887, %v356_v4   ;;  %376 = vperm.xlu0 %886, %v358_v5   ;;  %v509_v5 = vld [vmem:[%s344_s18] sm:$0xff]  ;;  %s913_s18 = scalar_lea.hbm %s912_s13, 8 }
  0x20   : > { %415 = vmatpush.bf16.msra.mxu0 %v403_v10  ;;  %434 = vmatpush.bf16.msra.mxu1 %v406_v11  ;;  %v530_v10 = vshrl.u32 %v529_v63, 7  ;;  %p914_p11 = scmp.ne.s32.totalorder %s912_s13, %s913_s18  ;;  %p919_p1 = scmp.lt.s32.totalorder %s917_s21, %s913_s18 }
  0x21   : > { %469 = vperm.xlu2 %888, %v461_v20  }
  0x22   : > { %p915_p12 = pnand %p914_p11, %p1107_p5  ;;  %p920_p2 = por %p919_p1, %p918_p0 }
  0x23   : > { %813 = vmatmul.msk.bf16.vlgmr.msra.gmra.mxu0 %vm394_vm1, %v832_v12  ;;  %815 = vmatmul.msk.bf16.vlgmr.msra.gmra.mxu1 %vm394_vm1, %v832_v12 }
  0x24   : > { %p916_p13 = pneg %p915_p12 }
  0x26   : > { %p921_p3 = pnand %p920_p2, %p916_p13 }
  0x33   : > { %814 = vmatmul.msk.bf16.gmra.mxu0 %vm394_vm1, %v833_v13  ;;  %816 = vmatmul.msk.bf16.gmra.mxu1 %vm394_vm1, %v833_v13 }
  0x73   : > { %v465_v51 = vpop.permute.xlu2 %464 }
  0x7b   : > { %v470_v60 = vpop.permute.xlu2 %469 }
  0x89   : > { %v362_v19 = vpop.permute.xlu1 %361  ;;  %v372_v21 = vpop.permute.xlu0 %371 }
  0x91   : > { %v367_v24 = vpop.permute.xlu1 %366  ;;  %v377_v25 = vpop.permute.xlu0 %376 }
  0xa0   : > { %v417_v14 = vpop.f32.mrf.mxu0  ;;  %v436_v15 = vpop.f32.mrf.mxu1 }
  0xa1   : > { %v418_v34 = vadd.f32 %v417_v14, %v362_v19  ;;  %v437_v35 = vadd.f32 %v436_v15, %v362_v19 }
  0xa3   : > { %v446_v44 = vmax.f32 %v418_v34, 0.0  ;;  %v447_v45 = vmax.f32 %v437_v35, 0.0 }
  0xa8   : > { %v419_v17 = vpop.f32.mrf.mxu0  ;;  %v438_v18 = vpop.f32.mrf.mxu1 }
  0xa9   : > { %v420_v30 = vadd.f32 %v419_v17, %v367_v24  ;;  %v439_v31 = vadd.f32 %v438_v18, %v367_v24 }
  0xab   : > { %v448_v40 = vmax.f32 %v420_v30, 0.0  ;;  %v449_v41 = vmax.f32 %v439_v31, 0.0 }
  0xad   : > { %v456_v48 = vpack.c.bf16 %v448_v40, %v446_v44  ;;  %v457_v49 = vpack.c.bf16 %v449_v41, %v447_v45 }
  0xb0   : > { %v422_v22 = vpop.f32.mrf.mxu0  ;;  %v441_v23 = vpop.f32.mrf.mxu1 }
  0xb1   : > { %v423_v26 = vadd.f32 %v422_v22, %v372_v21  ;;  %v442_v27 = vadd.f32 %v441_v23, %v372_v21 }
  0xb3   : > { %v450_v36 = vmax.f32 %v423_v26, 0.0  ;;  %v451_v37 = vmax.f32 %v442_v27, 0.0 }
  0xb8   : > { %v424_v28 = vpop.f32.mrf.mxu0  ;;  %v443_v29 = vpop.f32.mrf.mxu1 }
  0xb9   : > { %v425_v32 = vadd.f32 %v424_v28, %v377_v25  ;;  %v444_v33 = vadd.f32 %v443_v29, %v377_v25 }
  0xbb   : > { %v452_v38 = vmax.f32 %v425_v32, 0.0  ;;  %v453_v39 = vmax.f32 %v444_v33, 0.0 }
  0xbd   : > { %v458_v42 = vpack.c.bf16 %v452_v38, %v450_v36  ;;  %v459_v43 = vpack.c.bf16 %v453_v39, %v451_v37 }
  0xbf   : > { %487 = vmatpush.bf16.msra.mxu2 %v458_v42  ;;  %501 = vmatpush.bf16.msra.mxu3 %v459_v43 }
  0xc3   : > { %488 = vmatpush.bf16.msra.mxu2 %v456_v48  ;;  %502 = vmatpush.bf16.msra.mxu3 %v457_v49 }
  0xc6   : > { %821 = vmatmul.msk.bf16.vlgmr.msra.gmra.mxu2 %vm477_vm2, %v820_v50  ;;  %822 = vmatmul.msk.bf16.vlgmr.msra.gmra.mxu3 %vm477_vm2, %v820_v50 }
 0x149   : > { %v490_v52 = vpop.f32.mrf.mxu2  ;;  %v504_v53 = vpop.f32.mrf.mxu3 }
 0x14a   : > { %v491_v54 = vadd.f32 %v490_v52, %v465_v51  ;;  %v505_v55 = vadd.f32 %v504_v53, %v465_v51 }
 0x14c   : > { %v517_v56 = vrot.slane %v491_v54, 4  ;;  %v523_v57 = vrot.slane %v505_v55, 4 }
 0x14e   : > { %v518_v58 = vmax.f32 %v491_v54, %v517_v56  ;;  %v524_v59 = vmax.f32 %v505_v55, %v523_v57 }
 0x150   : > { %v519_v61 = vrot.slane %v518_v58, 2  ;;  %v525_v62 = vrot.slane %v524_v59, 2 }
 0x151   : > { %v492_v0 = vpop.f32.mrf.mxu2  ;;  %v506_v1 = vpop.f32.mrf.mxu3 }
 0x152   : > { %v520_v2 = vmax.f32 %v518_v58, %v519_v61  ;;  %v526_v3 = vmax.f32 %v524_v59, %v525_v62  ;;  %v507_v4 = vadd.f32 %v506_v1, %v470_v60  ;;  %v493_v8 = vadd.f32 %v492_v0, %v470_v60 }
 0x154   : > { %v521_v6 = vrot.slane %v520_v2, 1  ;;  %v527_v7 = vrot.slane %v526_v3, 1  ;;  %v512_v9 = vrot.slane %v507_v4, 4 }
 0x156   : > { %v522_v11 = vmax.f32 %v520_v2, %v521_v6  ;;  %v528_v12 = vmax.f32 %v526_v3, %v527_v7  ;;  %v513_v13 = vsel %vm401_vm0, %v493_v8, %v512_v9 }
 0x157   : > { %v515_v14 = vadd.f32 %v513_v13, %v509_v5 }
 0x158   : > { %vm531_vm3 = vcmp.ge.f32.partialorder %v491_v54, %v522_v11  ;;  %v561_v15 = vsub.f32 0.0, %v522_v11  ;;  %vm532_vm4 = vcmp.ge.f32.partialorder %v505_v55, %v528_v12  ;;  %v562_v16 = vsub.f32 0.0, %v528_v12 }
 0x159   : > { %v533_v17 = vsel %vm531_vm3, %v530_v10, 8  ;;  %v534_v18 = vsel %vm532_vm4, %v530_v10, 8  ;;  %516 = vst [vmem:[%s319_s22] sm:$0xff] %v515_v14 }
 0x15a   : > { %v535_v19 = vrot.slane %v533_v17, 4  ;;  %v563_v20 = vmul.f32 1.442695, %v561_v15  ;;  %v544_v21 = vrot.slane %v534_v18, 4  ;;  %v565_v22 = vmul.f32 1.442695, %v562_v16 }
 0x15b   : > { %924 = shalt.err (!%p921_p3)
}
 0x15c   : > { %836 = dma.vmem_to_hbm [thread:$0]  (%p1107_p5), %s630_s23, 128, %s632_s12, %s606_s26   ;;  %vm536_vm5 = vcmp.lt.s32.totalorder %v533_v17, %v535_v19  ;;  %889 = vpow2.f32 %v563_v20  ;;  %vm545_vm6 = vcmp.lt.s32.totalorder %v534_v18, %v544_v21  ;;  %vm554_vm11 = vcmask 1040384  }
 0x15d   : > { %v537_v23 = vsel %vm536_vm5, %v533_v17, %v535_v19  ;;  %v546_v24 = vsel %vm545_vm6, %v534_v18, %v544_v21  ;;  %891 = vpow2.f32 %v565_v22  ;;  %s1279_s10 = sshll.u32 %s1163_s25, 1  ;;  %s641_s18 = scalar_lea.hbm %s1276_s7, %s1118_s17  ;;  %vm1200_vm12 = vcmp.lt.s32.totalorder %v529_v63, 256 }
 0x15e   : > { %v538_v25 = vrot.slane %v537_v23, 2  ;;  %v547_v26 = vrot.slane %v546_v24, 2  ;;  %s610_s23 = sand.u32 1, %s1088_s9   ;;  %s326_s12 = scalar_lea.vmem [#allocation4], %s1279_s10 }
 0x15f   : > { %s643_s26 = sshll.u32 %s326_s12, 4  ;;  %s645_s19 = sshll.u32 %s641_s18, 4  ;;  %s644_s26 = int_to_ptr.vmem [resolvable:$true] %s643_s26  ;;  %s646_s19 = int_to_ptr.hbm [resolvable:$true] %s645_s19 }
 0x160   : > { %vm539_vm7 = vcmp.lt.s32.totalorder %v537_v23, %v538_v25  ;;  %vm548_vm8 = vcmp.lt.s32.totalorder %v546_v24, %v547_v26  ;;  %s1207_s9 = scalar_lea.sflag [#allocation5], %s610_s23  ;;  %s939_s20 = sshra.s32 %s646_s19, 4  ;;  %s940_s20 = int_to_ptr.hbm [resolvable:$true] %s939_s20 }
 0x161   : > { %v549_v27 = vsel %vm548_vm8, %v546_v24, %v547_v26  ;;  %v540_v28 = vsel %vm539_vm7, %v537_v23, %v538_v25  ;;  %s941_s21 = scalar_lea.hbm %s940_s20, 2  ;;  %s945_s13 = scalar_lea.hbm %s1276_s7, 4 }
 0x162   : > { %v890_v29 = vpop.eup %889  ;;  %v550_v30 = vrot.slane %v549_v27, 1  ;;  %v541_v31 = vrot.slane %v540_v28, 1  ;;  %p942_p4 = scmp.ne.s32.totalorder %s940_s20, %s941_s21  ;;  %p946_p9 = scmp.lt.s32.totalorder %s940_s20, %s1276_s7 }
 0x163   : > { %v892_v32 = vpop.eup %891  ;;  %v1193_v33 = vadd.f32 1.0, %v890_v29  ;;  %p947_p10 = scmp.lt.s32.totalorder %s945_s13, %s941_s21 }
 0x164   : > { %v568_v34 = vadd.f32 1.0, %v892_v32  ;;  %vm542_vm9 = vcmp.lt.s32.totalorder %v540_v28, %v541_v31  ;;  %vm551_vm10 = vcmp.lt.s32.totalorder %v549_v27, %v550_v30  ;;  %p943_p7 = pnand %p942_p4, %p1107_p5 }
 0x165   : > { %893 = vrcp.f32 %v1193_v33  ;;  %v552_v35 = vsel %vm551_vm10, %v549_v27, %v550_v30  ;;  %v543_v38 = vsel %vm542_vm9, %v540_v28, %v541_v31  ;;  %p948_p11 = por %p947_p10, %p946_p9 }
 0x166   : > { %895 = vrcp.f32 %v568_v34  ;;  %v553_v36 = vrot.slane %v552_v35, 7  ;;  %p944_p8 = pneg %p943_p7 }
 0x168   : > { %v555_v39 = vsel %vm554_vm11, %v543_v38, %v553_v36  ;;  %p949_p12 = pnand %p948_p11, %p944_p8 }
 0x169   : > { %560 = vst.msk [vmem:[%s326_s12] sm:$0x3] %vm1200_vm12, %v555_v39 }
 0x16a   : > { %952 = shalt.err (!%p949_p12)
}
 0x16b   : > { %837 = dma.vmem_to_hbm [thread:$0]  (%p1107_p5), %s644_s26, 32, %s646_s19, %s1207_s9   ;;  %v894_v40 = vpop.eup %893  ;;  %v595_v47 = vand.u32 2147483648, %v568_v34  ;;  %v593_v49 = vand.u32 2147483647, %v568_v34  ;;  %vm574_vm15 = vweird.f32 %v1193_v33  ;;  %v580_v51 = vand.u32 2147483648, %v1193_v33 }
 0x16c   : > { %v896_v41 = vpop.eup %895  ;;  %v570_v42 = vmul.f32 %v894_v40, %v1193_v33  ;;  %vm575_vm13 = vweird.f32 %v894_v40  ;;  %s655_s12 = scalar_lea.hbm %s1277_s8, %s1118_s17  ;;  %v578_v53 = vand.u32 2147483647, %v1193_v33  ;;  %vm589_vm1 = vweird.f32 %v568_v34  ;;  %s1286_s26 = sshll.u32 %s1163_s25, 1 }
 0x16d   : > { %v585_v43 = vmul.f32 %v896_v41, %v568_v34  ;;  %vm590_vm14 = vweird.f32 %v896_v41  ;;  %vm1227_vm0 = vmor %vm574_vm15, %vm575_vm13  ;;  %v596_v55 = vor.u32 1.1754944e-38, %v595_v47  ;;  %vm594_vm3 = vcmp.eq.f32.partialorder %v593_v49, 8.507059e+37  ;;  %s333_s19 = scalar_lea.vmem [#allocation6], %s1286_s26  ;;  %s659_s17 = sshll.u32 %s655_s12, 4  ;;  %s660_s17 = int_to_ptr.hbm [resolvable:$true] %s659_s17 }
 0x16e   : > { %v571_v44 = vsub.f32 1.0, %v570_v42  ;;  %vm591_vm2 = vmor %vm589_vm1, %vm590_vm14  ;;  %s657_s20 = sshll.u32 %s333_s19, 4  ;;  %v581_v58 = vor.u32 1.1754944e-38, %v580_v51  ;;  %vm579_vm4 = vcmp.eq.f32.partialorder %v578_v53, 8.507059e+37  ;;  %s967_s21 = sshra.s32 %s660_s17, 4  ;;  %s658_s20 = int_to_ptr.vmem [resolvable:$true] %s657_s20  ;;  %s968_s21 = int_to_ptr.hbm [resolvable:$true] %s967_s21 }
 0x16f   : > { %v586_v45 = vsub.f32 1.0, %v585_v43  ;;  %s969_s24 = scalar_lea.hbm %s968_s21, 2  ;;  %s973_s13 = scalar_lea.hbm %s1277_s8, 4 }
 0x170   : > { %v572_v46 = vmul.f32 %v894_v40, %v571_v44  ;;  %p970_p13 = scmp.ne.s32.totalorder %s968_s21, %s969_s24  ;;  %p974_p2 = scmp.lt.s32.totalorder %s968_s21, %s1277_s8 }
 0x171   : > { %v587_v48 = vmul.f32 %v896_v41, %v586_v45  ;;  %p975_p3 = scmp.lt.s32.totalorder %s973_s13, %s969_s24 }
 0x172   : > { %v573_v50 = vadd.f32 %v894_v40, %v572_v46  ;;  %p971_p0 = pnand %p970_p13, %p1107_p5 }
 0x173   : > { %v588_v54 = vadd.f32 %v896_v41, %v587_v48  ;;  %p976_p4 = por %p975_p3, %p974_p2 }
 0x174   : > { %v577_v56 = vsel %vm1227_vm0, %v894_v40, %v573_v50  ;;  %p972_p1 = pneg %p971_p0 }
 0x175   : > { %v592_v57 = vsel %vm591_vm2, %v896_v41, %v588_v54  ;;  %v582_v61 = vsel %vm579_vm4, %v581_v58, %v577_v56 }
 0x176   : > { %v597_v59 = vsel %vm594_vm3, %v596_v55, %v592_v57  ;;  %p977_p7 = pnand %p976_p4, %p972_p1 }
 0x177   : > { %v601_v60 = vrot.slane %v597_v59, 7 }
 0x179   : > { %v602_v62 = vsel %vm554_vm11, %v582_v61, %v601_v60 }
 0x17a   : > { %604 = vst.msk [vmem:[%s333_s19] sm:$0x3] %vm1200_vm12, %v602_v62 }
 0x17b   : > { %980 = shalt.err (!%p977_p7)
}
 0x17c   : > { %838 = dma.vmem_to_hbm [thread:$0]  (%p1107_p5), %s658_s20, 32, %s660_s17, %s1207_s9  }
 0x17d PF: > { %p852_p8 = scmp.ge.s32.totalorder %s1019_s30, 2  ;;  %s671_s23 = sand.u32 1, %s1007_s27  }
 0x17e   : > { %s672_s12 = scalar_lea.sflag [#allocation3], %s671_s23 }
 0x17f   : > { %p843_p9 = pnand %p852_p8, %p1111_p6 }
 0x181   : > { %p844_p10 = pneg %p843_p9 }
 0x183   : > { %998 = dma.done.wait (%p844_p10), %s672_s12, 128  }
 0x184   : > { %1000 = vsyncadd (%p844_p10), %s672_s12, 4294967168  ;;  %s1287_s26 = sadd.s32 4294967294, %s1019_s30  }
 0x185   : > { %s681_s19 = sand.u32 1, %s1287_s26  }
 0x186   : > { %s682_s21 = scalar_lea.sflag [#allocation5], %s681_s19 }
 0x187   : > { %1002 = dma.done.wait (%p844_p10), %s682_s21, 64  }
 0x188   : > { %1004 = vsyncadd (%p844_p10), %s682_s21, 4294967232  ;;  %p22_p5 = scmp.ge.s32.totalorder %s1092_s11, 4   ;;  %s1288_s27 = smov %s1011_s28 }
 0x189   : > { %s1289_s28 = smov %s1015_s29  ;;  %s1290_s29 = smov %s1105_s14 }
 0x18a   : > { %s1291_s30 = smov %s1092_s11  ;;  %24 = sbr.rel (!%p22_p5) target bundleno = 5 (0x5), region = 114 }
 0x18f   :  { %698 = vsyncpa [#allocation3], 1 }
 0x190   :  { %700 = vsyncpa [#allocation3 + $0x1], 1 }
 0x191   :  { %701 = vsyncpa [#allocation5], 1 }
 0x192   :  { %703 = vsyncpa [#allocation5 + $0x1], 1 }

</bundles_post_ra>
